<compile_context>
chip_gen: v7x
topology: tpu7x:2x2x1
jax: 0.10.0
libtpu: 0.0.40
codegen_flags: <defaults>
</compile_context>

<pallas_src>
import functools

import jax
import jax.numpy as jnp
from jax.experimental import pallas as pl
from jax.experimental.pallas import tpu as pltpu


# OGB-style atom feature dims used by get_atom_feature_dims()
FULL_ATOM_FEATURE_DIMS = [119, 4, 12, 12, 10, 6, 6, 2, 2]

# Multi-hot rows are written in groups of 16 (one native bf16 sublane tile),
# so every store is full-tile aligned.
_MH_GROUP = 16


def _round_down(x, m):
    return (x // m) * m


def _round_up(x, m):
    return ((x + m - 1) // m) * m


def _build_groups(feature_dims, build_rows, group):
    """For each `group`-row block of the concatenated table, the tuple of
    feature indices whose (offset) value range can land in that block."""
    spans = []
    off = 0
    for d in feature_dims:
        spans.append((off, off + d))
        off += d
    groups = []
    for lo in range(0, build_rows, group):
        hi = lo + group
        feats = tuple(i for i, (a, b) in enumerate(spans) if a < hi and b > lo)
        groups.append((lo, feats))
    return tuple(groups)


def _choose_tile_n(n, requested):
    """Pick the atom-tile size: big to amortize per-step overhead, but capped
    so the 1-D "parallel" grid has >= 2 steps (lets a v7x chip use both TCs)."""
    requested = max(128, _round_down(int(requested), 128))
    n128 = _round_up(max(int(n), 1), 128)
    if n128 <= 128:
        return 128
    cap = max(128, _round_down(n128 // 2, 128))
    return min(requested, cap)


def atom_encoder_kernel(idx_ref, table_ref, out_ref, mh_ref, *,
                        groups, group_rows, build_rows):
    """One atom tile.

    idx_ref:   [F, TN]      int32  offset indices (padded atoms hold -1)
    table_ref: [E, D_PAD]   bf16   concatenated + zero-padded tables, transposed
    out_ref:   [E, TN]      f32    lane-dense output (atoms on the lane axis)
    mh_ref:    [D_PAD, TN]  bf16   scratch: transposed multi-hot matrix
    """
    tn = out_ref.shape[1]
    d_pad = mh_ref.shape[0]

    # Row-index iota for one 16-row group, hoisted out of the unrolled loop
    # (JAX does not CSE broadcast_in_dim) and reused by every group.
    base = jax.lax.broadcasted_iota(jnp.int32, (group_rows, tn), 0)

    # Build multihot^T[j, a] = any_f (idx[f, a] == j), one disjoint 16-row
    # group at a time.  Each group is written exactly once with '=': no zero
    # pass, no read-modify-write.  Compare/accumulate in f32 vregs (v5e has no
    # bf16 VPU ALU); cast to bf16 only at the store.  Values are exactly 0/1.
    for lo, feats in groups:
        acc = None
        for fi in feats:
            hit = (base == (idx_ref[fi:fi + 1, :] - lo)).astype(jnp.float32)
            acc = hit if acc is None else acc + hit
        if acc is None:
            mh_ref[lo:lo + group_rows, :] = jnp.zeros((group_rows, tn),
                                                      mh_ref.dtype)
        else:
            mh_ref[lo:lo + group_rows, :] = acc.astype(mh_ref.dtype)

    # Rows [build_rows, d_pad) hit zero-padded table columns, but the VMEM
    # scratch is uninitialized (could hold NaN patterns and 0 * NaN = NaN),
    # so zero just those rows.
    if build_rows < d_pad:
        mh_ref[build_rows:, :] = jnp.zeros((d_pad - build_rows, tn),
                                           mh_ref.dtype)

    # Summed embedding lookup == table^T @ multihot^T: one MXU matmul with
    # bf16 operands and f32 accumulation (K = d_pad is 128-aligned).
    out_ref[...] = jnp.dot(table_ref[...], mh_ref[...],
                           preferred_element_type=jnp.float32)


def prepare_atom_encoder(tables):
    """One-time prep: pack the per-feature tables into the kernel's layout.

    tables: list of [dim_i, emb_dim] float32 arrays.
    Returns a dict consumed by atom_encoder_forward.
    """
    dims = [int(t.shape[0]) for t in tables]
    emb_dim = int(tables[0].shape[1])
    d_total = sum(dims)
    build_rows = _round_up(d_total, _MH_GROUP)     # rows actually built (176)
    d_pad = _round_up(build_rows, 128)             # MXU-aligned contraction dim

    # Concatenated, zero-padded, bf16, transposed table: [emb_dim, D_PAD].
    big = jnp.concatenate([t.astype(jnp.float32) for t in tables], axis=0)
    big = jnp.pad(big, ((0, d_pad - d_total), (0, 0)))
    table_t = jnp.asarray(big.astype(jnp.bfloat16).T)

    offsets = jnp.asarray([sum(dims[:i]) for i in range(len(dims))], jnp.int32)
    groups = _build_groups(dims, build_rows, _MH_GROUP)

    return dict(table_t=table_t, offsets=offsets, groups=groups,
                d_pad=d_pad, build_rows=build_rows,
                emb_dim=emb_dim, num_features=len(dims))


def atom_encoder_forward(x, enc, *, tile_n=1024):
    """x: [N, F] int atom features, enc: prepare_atom_encoder(...) output.
    Returns [N, emb_dim] float32 (matching the PyTorch module)."""
    n, f = x.shape
    assert f == enc["num_features"]
    emb_dim = enc["emb_dim"]
    d_pad = enc["d_pad"]

    tile_n = _choose_tile_n(n, tile_n)
    n_pad = _round_up(max(n, 1), tile_n)

    # Offset indices, transposed to [F, N] (atoms on the lane axis), padded to
    # the tile size with -1 (matches nothing -> padded atoms produce zeros).
    idx_t = (x.astype(jnp.int32) + enc["offsets"][None, :]).T
    idx_t = jnp.pad(idx_t, ((0, 0), (0, n_pad - n)), constant_values=-1)

    kernel = functools.partial(atom_encoder_kernel,
                               groups=enc["groups"],
                               group_rows=_MH_GROUP,
                               build_rows=enc["build_rows"])

    out_t = pl.pallas_call(
        kernel,
        out_shape=jax.ShapeDtypeStruct((emb_dim, n_pad), jnp.float32),
        grid=(n_pad // tile_n,),
        in_specs=[
            pl.BlockSpec((f, tile_n), lambda i: (0, i)),          # idx tile
            pl.BlockSpec((emb_dim, d_pad), lambda i: (0, 0)),     # resident table
        ],
        out_specs=pl.BlockSpec((emb_dim, tile_n), lambda i: (0, i)),
        scratch_shapes=[pltpu.VMEM((d_pad, tile_n), jnp.bfloat16)],
        compiler_params=pltpu.CompilerParams(
            dimension_semantics=("parallel",)),
    )(idx_t, enc["table_t"])

    # Back to atom-major [N, emb_dim] to match the module's output layout.
    # (For emb_dim >= 128 one would emit [N, emb_dim] from the kernel instead.)
    return out_t[:, :n].T


def make_atom_encoder_params(emb_dim, feature_dims, key):
    """Xavier-uniform init for each embedding table (deterministic)."""
    tables = []
    for i, dim in enumerate(feature_dims):
        k = jax.random.fold_in(key, i)
        bound = (6.0 / (dim + emb_dim)) ** 0.5
        tables.append(jax.random.uniform(k, (dim, emb_dim), jnp.float32,
                                         minval=-bound, maxval=bound))
    return tables


def atom_encoder_reference(x, tables):
    """Pure-JAX reference matching the PyTorch forward."""
    acc = 0
    for i, t in enumerate(tables):
        acc = acc + t[x[:, i]]
    return acc


if __name__ == "__main__":
    key = jax.random.PRNGKey(0)
    emb_dim = 32
    num_atoms = 200            # small, but exercises 2 grid tiles + padding
    feature_dims = FULL_ATOM_FEATURE_DIMS

    # Deterministic parameters + one-time packed-table prep.
    tables = make_atom_encoder_params(emb_dim, feature_dims,
                                      jax.random.fold_in(key, 100))
    enc = prepare_atom_encoder(tables)

    # Deterministic integer atom features within each feature's range.
    k_x = jax.random.fold_in(key, 200)
    cols = []
    for i, dim in enumerate(feature_dims):
        ki = jax.random.fold_in(k_x, i)
        cols.append(jax.random.randint(ki, (num_atoms, 1), 0, dim, jnp.int32))
    x = jnp.concatenate(cols, axis=1)   # [N, F] int32

    out = jax.block_until_ready(atom_encoder_forward(x, enc))
    assert out.shape == (num_atoms, emb_dim)

    # The kernel feeds the MXU bf16 table values with f32 accumulation: check
    # tightly against a bf16-rounded-table reference and loosely against the
    # full-f32 reference.
    tables_bf16 = [t.astype(jnp.bfloat16).astype(jnp.float32) for t in tables]
    ref_bf16 = atom_encoder_reference(x, tables_bf16)
    ref_f32 = atom_encoder_reference(x, tables)
    assert jnp.allclose(out, ref_bf16, atol=1e-4, rtol=1e-4), \
        "mismatch vs bf16-table reference"
    assert jnp.allclose(out, ref_f32, atol=2e-2, rtol=2e-2), \
        "mismatch vs f32 reference"

    print("KERNEL_OK")
</pallas_src>

<mosaic_0001>
module attributes {stable_mosaic.version = 11 : i64} {
  func.func @atom_encoder_kernel(%arg0: i32, %arg1: memref<9x128xi32, #tpu.memory_space<vmem>>, %arg2: memref<32x256xbf16, #tpu.memory_space<vmem>>, %arg3: memref<32x128xf32, #tpu.memory_space<vmem>>, %arg4: memref<256x128xbf16, #tpu.memory_space<vmem>>) attributes {dimension_semantics = [#tpu.dimension_semantics<parallel>], iteration_bounds = array<i64: 2>, scalar_prefetch = 0 : i64, scratch_operands = 1 : i64, tpu.core_type = #tpu.core_type<tc>, window_params = [{transform_indices = @transform_0, window_bounds = array<i64: 9, 128>}, {pipeline_mode = #tpu.pipeline_mode<synchronous>, transform_indices = @transform_1, window_bounds = array<i64: 32, 256>}, {transform_indices = @transform_2, window_bounds = array<i64: 32, 128>}]} {
    %0 = tpu.iota {dimensions = array<i32: 0>} : vector<16x128xi32>
    %c0 = arith.constant 0 : index
    %c0_0 = arith.constant 0 : index
    %1 = vector.load %arg1[%c0, %c0_0] : memref<9x128xi32, #tpu.memory_space<vmem>>, vector<1x128xi32>
    %c0_i32 = arith.constant 0 : i32
    %2 = vector.broadcast %c0_i32 : i32 to vector<1x128xi32>
    %3 = arith.subi %1, %2 : vector<1x128xi32>
    %4 = vector.broadcast %3 : vector<1x128xi32> to vector<16x128xi32>
    %5 = arith.cmpi eq, %0, %4 : vector<16x128xi32>
    %6 = arith.extui %5 : vector<16x128xi1> to vector<16x128xi32>
    %7 = arith.sitofp %6 : vector<16x128xi32> to vector<16x128xf32>
    %8 = arith.truncf %7 : vector<16x128xf32> to vector<16x128xbf16>
    %c0_1 = arith.constant 0 : index
    %c0_2 = arith.constant 0 : index
    %9 = vector.load %arg4[%c0_1, %c0_2] : memref<256x128xbf16, #tpu.memory_space<vmem>>, vector<16x128xbf16>
    tpu.vector_store %arg4[%c0_1, %c0_2], %8 {strides = array<i32>} : memref<256x128xbf16, #tpu.memory_space<vmem>>, vector<16x128xbf16>,
    %c0_3 = arith.constant 0 : index
    %c0_4 = arith.constant 0 : index
    %10 = vector.load %arg1[%c0_3, %c0_4] : memref<9x128xi32, #tpu.memory_space<vmem>>, vector<1x128xi32>
    %c16_i32 = arith.constant 16 : i32
    %11 = vector.broadcast %c16_i32 : i32 to vector<1x128xi32>
    %12 = arith.subi %10, %11 : vector<1x128xi32>
    %13 = vector.broadcast %12 : vector<1x128xi32> to vector<16x128xi32>
    %14 = arith.cmpi eq, %0, %13 : vector<16x128xi32>
    %15 = arith.extui %14 : vector<16x128xi1> to vector<16x128xi32>
    %16 = arith.sitofp %15 : vector<16x128xi32> to vector<16x128xf32>
    %17 = arith.truncf %16 : vector<16x128xf32> to vector<16x128xbf16>
    %c16 = arith.constant 16 : index
    %c0_5 = arith.constant 0 : index
    %18 = vector.load %arg4[%c16, %c0_5] : memref<256x128xbf16, #tpu.memory_space<vmem>>, vector<16x128xbf16>
    tpu.vector_store %arg4[%c16, %c0_5], %17 {strides = array<i32>} : memref<256x128xbf16, #tpu.memory_space<vmem>>, vector<16x128xbf16>,
    %c0_6 = arith.constant 0 : index
    %c0_7 = arith.constant 0 : index
    %19 = vector.load %arg1[%c0_6, %c0_7] : memref<9x128xi32, #tpu.memory_space<vmem>>, vector<1x128xi32>
    %c32_i32 = arith.constant 32 : i32
    %20 = vector.broadcast %c32_i32 : i32 to vector<1x128xi32>
    %21 = arith.subi %19, %20 : vector<1x128xi32>
    %22 = vector.broadcast %21 : vector<1x128xi32> to vector<16x128xi32>
    %23 = arith.cmpi eq, %0, %22 : vector<16x128xi32>
    %24 = arith.extui %23 : vector<16x128xi1> to vector<16x128xi32>
    %25 = arith.sitofp %24 : vector<16x128xi32> to vector<16x128xf32>
    %26 = arith.truncf %25 : vector<16x128xf32> to vector<16x128xbf16>
    %c32 = arith.constant 32 : index
    %c0_8 = arith.constant 0 : index
    %27 = vector.load %arg4[%c32, %c0_8] : memref<256x128xbf16, #tpu.memory_space<vmem>>, vector<16x128xbf16>
    tpu.vector_store %arg4[%c32, %c0_8], %26 {strides = array<i32>} : memref<256x128xbf16, #tpu.memory_space<vmem>>, vector<16x128xbf16>,
    %c0_9 = arith.constant 0 : index
    %c0_10 = arith.constant 0 : index
    %28 = vector.load %arg1[%c0_9, %c0_10] : memref<9x128xi32, #tpu.memory_space<vmem>>, vector<1x128xi32>
    %c48_i32 = arith.constant 48 : i32
    %29 = vector.broadcast %c48_i32 : i32 to vector<1x128xi32>
    %30 = arith.subi %28, %29 : vector<1x128xi32>
    %31 = vector.broadcast %30 : vector<1x128xi32> to vector<16x128xi32>
    %32 = arith.cmpi eq, %0, %31 : vector<16x128xi32>
    %33 = arith.extui %32 : vector<16x128xi1> to vector<16x128xi32>
    %34 = arith.sitofp %33 : vector<16x128xi32> to vector<16x128xf32>
    %35 = arith.truncf %34 : vector<16x128xf32> to vector<16x128xbf16>
    %c48 = arith.constant 48 : index
    %c0_11 = arith.constant 0 : index
    %36 = vector.load %arg4[%c48, %c0_11] : memref<256x128xbf16, #tpu.memory_space<vmem>>, vector<16x128xbf16>
    tpu.vector_store %arg4[%c48, %c0_11], %35 {strides = array<i32>} : memref<256x128xbf16, #tpu.memory_space<vmem>>, vector<16x128xbf16>,
    %c0_12 = arith.constant 0 : index
    %c0_13 = arith.constant 0 : index
    %37 = vector.load %arg1[%c0_12, %c0_13] : memref<9x128xi32, #tpu.memory_space<vmem>>, vector<1x128xi32>
    %c64_i32 = arith.constant 64 : i32
    %38 = vector.broadcast %c64_i32 : i32 to vector<1x128xi32>
    %39 = arith.subi %37, %38 : vector<1x128xi32>
    %40 = vector.broadcast %39 : vector<1x128xi32> to vector<16x128xi32>
    %41 = arith.cmpi eq, %0, %40 : vector<16x128xi32>
    %42 = arith.extui %41 : vector<16x128xi1> to vector<16x128xi32>
    %43 = arith.sitofp %42 : vector<16x128xi32> to vector<16x128xf32>
    %44 = arith.truncf %43 : vector<16x128xf32> to vector<16x128xbf16>
    %c64 = arith.constant 64 : index
    %c0_14 = arith.constant 0 : index
    %45 = vector.load %arg4[%c64, %c0_14] : memref<256x128xbf16, #tpu.memory_space<vmem>>, vector<16x128xbf16>
    tpu.vector_store %arg4[%c64, %c0_14], %44 {strides = array<i32>} : memref<256x128xbf16, #tpu.memory_space<vmem>>, vector<16x128xbf16>,
    %c0_15 = arith.constant 0 : index
    %c0_16 = arith.constant 0 : index
    %46 = vector.load %arg1[%c0_15, %c0_16] : memref<9x128xi32, #tpu.memory_space<vmem>>, vector<1x128xi32>
    %c80_i32 = arith.constant 80 : i32
    %47 = vector.broadcast %c80_i32 : i32 to vector<1x128xi32>
    %48 = arith.subi %46, %47 : vector<1x128xi32>
    %49 = vector.broadcast %48 : vector<1x128xi32> to vector<16x128xi32>
    %50 = arith.cmpi eq, %0, %49 : vector<16x128xi32>
    %51 = arith.extui %50 : vector<16x128xi1> to vector<16x128xi32>
    %52 = arith.sitofp %51 : vector<16x128xi32> to vector<16x128xf32>
    %53 = arith.truncf %52 : vector<16x128xf32> to vector<16x128xbf16>
    %c80 = arith.constant 80 : index
    %c0_17 = arith.constant 0 : index
    %54 = vector.load %arg4[%c80, %c0_17] : memref<256x128xbf16, #tpu.memory_space<vmem>>, vector<16x128xbf16>
    tpu.vector_store %arg4[%c80, %c0_17], %53 {strides = array<i32>} : memref<256x128xbf16, #tpu.memory_space<vmem>>, vector<16x128xbf16>,
    %c0_18 = arith.constant 0 : index
    %c0_19 = arith.constant 0 : index
    %55 = vector.load %arg1[%c0_18, %c0_19] : memref<9x128xi32, #tpu.memory_space<vmem>>, vector<1x128xi32>
    %c96_i32 = arith.constant 96 : i32
    %56 = vector.broadcast %c96_i32 : i32 to vector<1x128xi32>
    %57 = arith.subi %55, %56 : vector<1x128xi32>
    %58 = vector.broadcast %57 : vector<1x128xi32> to vector<16x128xi32>
    %59 = arith.cmpi eq, %0, %58 : vector<16x128xi32>
    %60 = arith.extui %59 : vector<16x128xi1> to vector<16x128xi32>
    %61 = arith.sitofp %60 : vector<16x128xi32> to vector<16x128xf32>
    %62 = arith.truncf %61 : vector<16x128xf32> to vector<16x128xbf16>
    %c96 = arith.constant 96 : index
    %c0_20 = arith.constant 0 : index
    %63 = vector.load %arg4[%c96, %c0_20] : memref<256x128xbf16, #tpu.memory_space<vmem>>, vector<16x128xbf16>
    tpu.vector_store %arg4[%c96, %c0_20], %62 {strides = array<i32>} : memref<256x128xbf16, #tpu.memory_space<vmem>>, vector<16x128xbf16>,
    %c0_21 = arith.constant 0 : index
    %c0_22 = arith.constant 0 : index
    %64 = vector.load %arg1[%c0_21, %c0_22] : memref<9x128xi32, #tpu.memory_space<vmem>>, vector<1x128xi32>
    %c112_i32 = arith.constant 112 : i32
    %65 = vector.broadcast %c112_i32 : i32 to vector<1x128xi32>
    %66 = arith.subi %64, %65 : vector<1x128xi32>
    %67 = vector.broadcast %66 : vector<1x128xi32> to vector<16x128xi32>
    %68 = arith.cmpi eq, %0, %67 : vector<16x128xi32>
    %69 = arith.extui %68 : vector<16x128xi1> to vector<16x128xi32>
    %70 = arith.sitofp %69 : vector<16x128xi32> to vector<16x128xf32>
    %c1 = arith.constant 1 : index
    %c0_23 = arith.constant 0 : index
    %71 = vector.load %arg1[%c1, %c0_23] : memref<9x128xi32, #tpu.memory_space<vmem>>, vector<1x128xi32>
    %c112_i32_24 = arith.constant 112 : i32
    %72 = vector.broadcast %c112_i32_24 : i32 to vector<1x128xi32>
    %73 = arith.subi %71, %72 : vector<1x128xi32>
    %74 = vector.broadcast %73 : vector<1x128xi32> to vector<16x128xi32>
    %75 = arith.cmpi eq, %0, %74 : vector<16x128xi32>
    %76 = arith.extui %75 : vector<16x128xi1> to vector<16x128xi32>
    %77 = arith.sitofp %76 : vector<16x128xi32> to vector<16x128xf32>
    %78 = arith.addf %70, %77 : vector<16x128xf32>
    %c2 = arith.constant 2 : index
    %c0_25 = arith.constant 0 : index
    %79 = vector.load %arg1[%c2, %c0_25] : memref<9x128xi32, #tpu.memory_space<vmem>>, vector<1x128xi32>
    %c112_i32_26 = arith.constant 112 : i32
    %80 = vector.broadcast %c112_i32_26 : i32 to vector<1x128xi32>
    %81 = arith.subi %79, %80 : vector<1x128xi32>
    %82 = vector.broadcast %81 : vector<1x128xi32> to vector<16x128xi32>
    %83 = arith.cmpi eq, %0, %82 : vector<16x128xi32>
    %84 = arith.extui %83 : vector<16x128xi1> to vector<16x128xi32>
    %85 = arith.sitofp %84 : vector<16x128xi32> to vector<16x128xf32>
    %86 = arith.addf %78, %85 : vector<16x128xf32>
    %87 = arith.truncf %86 : vector<16x128xf32> to vector<16x128xbf16>
    %c112 = arith.constant 112 : index
    %c0_27 = arith.constant 0 : index
    %88 = vector.load %arg4[%c112, %c0_27] : memref<256x128xbf16, #tpu.memory_space<vmem>>, vector<16x128xbf16>
    tpu.vector_store %arg4[%c112, %c0_27], %87 {strides = array<i32>} : memref<256x128xbf16, #tpu.memory_space<vmem>>, vector<16x128xbf16>,
    %c2_28 = arith.constant 2 : index
    %c0_29 = arith.constant 0 : index
    %89 = vector.load %arg1[%c2_28, %c0_29] : memref<9x128xi32, #tpu.memory_space<vmem>>, vector<1x128xi32>
    %c128_i32 = arith.constant 128 : i32
    %90 = vector.broadcast %c128_i32 : i32 to vector<1x128xi32>
    %91 = arith.subi %89, %90 : vector<1x128xi32>
    %92 = vector.broadcast %91 : vector<1x128xi32> to vector<16x128xi32>
    %93 = arith.cmpi eq, %0, %92 : vector<16x128xi32>
    %94 = arith.extui %93 : vector<16x128xi1> to vector<16x128xi32>
    %95 = arith.sitofp %94 : vector<16x128xi32> to vector<16x128xf32>
    %c3 = arith.constant 3 : index
    %c0_30 = arith.constant 0 : index
    %96 = vector.load %arg1[%c3, %c0_30] : memref<9x128xi32, #tpu.memory_space<vmem>>, vector<1x128xi32>
    %c128_i32_31 = arith.constant 128 : i32
    %97 = vector.broadcast %c128_i32_31 : i32 to vector<1x128xi32>
    %98 = arith.subi %96, %97 : vector<1x128xi32>
    %99 = vector.broadcast %98 : vector<1x128xi32> to vector<16x128xi32>
    %100 = arith.cmpi eq, %0, %99 : vector<16x128xi32>
    %101 = arith.extui %100 : vector<16x128xi1> to vector<16x128xi32>
    %102 = arith.sitofp %101 : vector<16x128xi32> to vector<16x128xf32>
    %103 = arith.addf %95, %102 : vector<16x128xf32>
    %104 = arith.truncf %103 : vector<16x128xf32> to vector<16x128xbf16>
    %c128 = arith.constant 128 : index
    %c0_32 = arith.constant 0 : index
    %105 = vector.load %arg4[%c128, %c0_32] : memref<256x128xbf16, #tpu.memory_space<vmem>>, vector<16x128xbf16>
    tpu.vector_store %arg4[%c128, %c0_32], %104 {strides = array<i32>} : memref<256x128xbf16, #tpu.memory_space<vmem>>, vector<16x128xbf16>,
    %c3_33 = arith.constant 3 : index
    %c0_34 = arith.constant 0 : index
    %106 = vector.load %arg1[%c3_33, %c0_34] : memref<9x128xi32, #tpu.memory_space<vmem>>, vector<1x128xi32>
    %c144_i32 = arith.constant 144 : i32
    %107 = vector.broadcast %c144_i32 : i32 to vector<1x128xi32>
    %108 = arith.subi %106, %107 : vector<1x128xi32>
    %109 = vector.broadcast %108 : vector<1x128xi32> to vector<16x128xi32>
    %110 = arith.cmpi eq, %0, %109 : vector<16x128xi32>
    %111 = arith.extui %110 : vector<16x128xi1> to vector<16x128xi32>
    %112 = arith.sitofp %111 : vector<16x128xi32> to vector<16x128xf32>
    %c4 = arith.constant 4 : index
    %c0_35 = arith.constant 0 : index
    %113 = vector.load %arg1[%c4, %c0_35] : memref<9x128xi32, #tpu.memory_space<vmem>>, vector<1x128xi32>
    %c144_i32_36 = arith.constant 144 : i32
    %114 = vector.broadcast %c144_i32_36 : i32 to vector<1x128xi32>
    %115 = arith.subi %113, %114 : vector<1x128xi32>
    %116 = vector.broadcast %115 : vector<1x128xi32> to vector<16x128xi32>
    %117 = arith.cmpi eq, %0, %116 : vector<16x128xi32>
    %118 = arith.extui %117 : vector<16x128xi1> to vector<16x128xi32>
    %119 = arith.sitofp %118 : vector<16x128xi32> to vector<16x128xf32>
    %120 = arith.addf %112, %119 : vector<16x128xf32>
    %c5 = arith.constant 5 : index
    %c0_37 = arith.constant 0 : index
    %121 = vector.load %arg1[%c5, %c0_37] : memref<9x128xi32, #tpu.memory_space<vmem>>, vector<1x128xi32>
    %c144_i32_38 = arith.constant 144 : i32
    %122 = vector.broadcast %c144_i32_38 : i32 to vector<1x128xi32>
    %123 = arith.subi %121, %122 : vector<1x128xi32>
    %124 = vector.broadcast %123 : vector<1x128xi32> to vector<16x128xi32>
    %125 = arith.cmpi eq, %0, %124 : vector<16x128xi32>
    %126 = arith.extui %125 : vector<16x128xi1> to vector<16x128xi32>
    %127 = arith.sitofp %126 : vector<16x128xi32> to vector<16x128xf32>
    %128 = arith.addf %120, %127 : vector<16x128xf32>
    %129 = arith.truncf %128 : vector<16x128xf32> to vector<16x128xbf16>
    %c144 = arith.constant 144 : index
    %c0_39 = arith.constant 0 : index
    %130 = vector.load %arg4[%c144, %c0_39] : memref<256x128xbf16, #tpu.memory_space<vmem>>, vector<16x128xbf16>
    tpu.vector_store %arg4[%c144, %c0_39], %129 {strides = array<i32>} : memref<256x128xbf16, #tpu.memory_space<vmem>>, vector<16x128xbf16>,
    %c5_40 = arith.constant 5 : index
    %c0_41 = arith.constant 0 : index
    %131 = vector.load %arg1[%c5_40, %c0_41] : memref<9x128xi32, #tpu.memory_space<vmem>>, vector<1x128xi32>
    %c160_i32 = arith.constant 160 : i32
    %132 = vector.broadcast %c160_i32 : i32 to vector<1x128xi32>
    %133 = arith.subi %131, %132 : vector<1x128xi32>
    %134 = vector.broadcast %133 : vector<1x128xi32> to vector<16x128xi32>
    %135 = arith.cmpi eq, %0, %134 : vector<16x128xi32>
    %136 = arith.extui %135 : vector<16x128xi1> to vector<16x128xi32>
    %137 = arith.sitofp %136 : vector<16x128xi32> to vector<16x128xf32>
    %c6 = arith.constant 6 : index
    %c0_42 = arith.constant 0 : index
    %138 = vector.load %arg1[%c6, %c0_42] : memref<9x128xi32, #tpu.memory_space<vmem>>, vector<1x128xi32>
    %c160_i32_43 = arith.constant 160 : i32
    %139 = vector.broadcast %c160_i32_43 : i32 to vector<1x128xi32>
    %140 = arith.subi %138, %139 : vector<1x128xi32>
    %141 = vector.broadcast %140 : vector<1x128xi32> to vector<16x128xi32>
    %142 = arith.cmpi eq, %0, %141 : vector<16x128xi32>
    %143 = arith.extui %142 : vector<16x128xi1> to vector<16x128xi32>
    %144 = arith.sitofp %143 : vector<16x128xi32> to vector<16x128xf32>
    %145 = arith.addf %137, %144 : vector<16x128xf32>
    %c7 = arith.constant 7 : index
    %c0_44 = arith.constant 0 : index
    %146 = vector.load %arg1[%c7, %c0_44] : memref<9x128xi32, #tpu.memory_space<vmem>>, vector<1x128xi32>
    %c160_i32_45 = arith.constant 160 : i32
    %147 = vector.broadcast %c160_i32_45 : i32 to vector<1x128xi32>
    %148 = arith.subi %146, %147 : vector<1x128xi32>
    %149 = vector.broadcast %148 : vector<1x128xi32> to vector<16x128xi32>
    %150 = arith.cmpi eq, %0, %149 : vector<16x128xi32>
    %151 = arith.extui %150 : vector<16x128xi1> to vector<16x128xi32>
    %152 = arith.sitofp %151 : vector<16x128xi32> to vector<16x128xf32>
    %153 = arith.addf %145, %152 : vector<16x128xf32>
    %c8 = arith.constant 8 : index
    %c0_46 = arith.constant 0 : index
    %154 = vector.load %arg1[%c8, %c0_46] : memref<9x128xi32, #tpu.memory_space<vmem>>, vector<1x128xi32>
    %c160_i32_47 = arith.constant 160 : i32
    %155 = vector.broadcast %c160_i32_47 : i32 to vector<1x128xi32>
    %156 = arith.subi %154, %155 : vector<1x128xi32>
    %157 = vector.broadcast %156 : vector<1x128xi32> to vector<16x128xi32>
    %158 = arith.cmpi eq, %0, %157 : vector<16x128xi32>
    %159 = arith.extui %158 : vector<16x128xi1> to vector<16x128xi32>
    %160 = arith.sitofp %159 : vector<16x128xi32> to vector<16x128xf32>
    %161 = arith.addf %153, %160 : vector<16x128xf32>
    %162 = arith.truncf %161 : vector<16x128xf32> to vector<16x128xbf16>
    %c160 = arith.constant 160 : index
    %c0_48 = arith.constant 0 : index
    %163 = vector.load %arg4[%c160, %c0_48] : memref<256x128xbf16, #tpu.memory_space<vmem>>, vector<16x128xbf16>
    tpu.vector_store %arg4[%c160, %c0_48], %162 {strides = array<i32>} : memref<256x128xbf16, #tpu.memory_space<vmem>>, vector<16x128xbf16>,
    %cst = arith.constant 0.000000e+00 : bf16
    %164 = vector.broadcast %cst : bf16 to vector<80x128xbf16>
    %c176 = arith.constant 176 : index
    %c0_49 = arith.constant 0 : index
    %165 = vector.load %arg4[%c176, %c0_49] : memref<256x128xbf16, #tpu.memory_space<vmem>>, vector<80x128xbf16>
    tpu.vector_store %arg4[%c176, %c0_49], %164 {strides = array<i32>} : memref<256x128xbf16, #tpu.memory_space<vmem>>, vector<80x128xbf16>,
    %c0_50 = arith.constant 0 : index
    %c0_51 = arith.constant 0 : index
    %166 = vector.load %arg2[%c0_50, %c0_51] : memref<32x256xbf16, #tpu.memory_space<vmem>>, vector<32x256xbf16>
    %c0_52 = arith.constant 0 : index
    %c0_53 = arith.constant 0 : index
    %167 = vector.load %arg4[%c0_52, %c0_53] : memref<256x128xbf16, #tpu.memory_space<vmem>>, vector<256x128xbf16>
    %cst_54 = arith.constant dense<0.000000e+00> : vector<32x128xf32>
    %168 = tpu.matmul %166, %167, %cst_54 {dimension_numbers = #tpu.dot_dimension_numbers<[1], [0], [0], [1], [0, 0, 1, 1], [], []>} : vector<32x256xbf16>, vector<256x128xbf16>, vector<32x128xf32> -> vector<32x128xf32>
    %c0_55 = arith.constant 0 : index
    %c0_56 = arith.constant 0 : index
    %169 = vector.load %arg3[%c0_55, %c0_56] : memref<32x128xf32, #tpu.memory_space<vmem>>, vector<32x128xf32>
    tpu.vector_store %arg3[%c0_55, %c0_56], %168 {strides = array<i32>} : memref<32x128xf32, #tpu.memory_space<vmem>>, vector<32x128xf32>,
    return
  }
  func.func @transform_0(%arg0: i32) -> (i32, i32) {
    %c0_i32 = arith.constant 0 : i32
    %c0_i32_0 = arith.constant 0 : i32
    return %c0_i32, %arg0 : i32, i32
  }
  func.func @transform_1(%arg0: i32) -> (i32, i32) {
    %c0_i32 = arith.constant 0 : i32
    %c0_i32_0 = arith.constant 0 : i32
    %c0_i32_1 = arith.constant 0 : i32
    return %c0_i32, %c0_i32_0 : i32, i32
  }
  func.func @transform_2(%arg0: i32) -> (i32, i32) {
    %c0_i32 = arith.constant 0 : i32
    %c0_i32_0 = arith.constant 0 : i32
    return %c0_i32, %arg0 : i32, i32
  }
}

</mosaic_0001>

<bundles_post_ra>
// kernel: tpu_custom_call.1
= control target key start
LH: loop header
LB: loop body
LE: loop exit
PB: predicated region body
PF: predicated region fallthrough
CT: control target
= control target key end

     0   :  { %7 = vsyncpa [#allocation4], 0  ;;  %s1382_s0 = inlined_call_operand.hbm [shape: s32[9,256], index: 0, kind: input, shape index: {}]   ;;  %s1383_s1 = inlined_call_operand.hbm [shape: bf16[32,256], index: 1, kind: input, shape index: {}]   ;;  %s1384_s2 = inlined_call_operand.hbm [shape: f32[32,256], index: 2, kind: output, shape index: {}]  }
   0x1   :  { %9 = vsyncpa [#allocation4 + $0x1], 0 }
   0x2   :  { %10 = vsyncpa [#allocation7], 0 }
   0x3   :  { %11 = vsyncpa [#allocation5], 0 }
   0x4   :  { %13 = vsyncpa [#allocation5 + $0x1], 0  ;;  %s979_s9 = smov 0   ;;  %s981_s10 = smov 0  }
   0x5   :  { %s983_s11 = smov 0   ;;  %s985_s12 = smov 0  }
   0x6 LB: > { %s1000_s13 = sadd.s32 4294967295, %s950_s12   ;;  %s639_s14 = sadd.s32 4294967294, %s950_s12   ;;  %s950_s12 = sphi %s985_s12, %s1412_s12   ;;  %s946_s11 = sphi %s983_s11, %s1411_s11   ;;  %s942_s10 = sphi %s981_s10, %s1410_s10   ;;  %s938_s9 = sphi %s979_s9, %s1409_s9  }
   0x7   : > { %s1004_s15 = sadd.s32 1, %s950_s12   ;;  %s26_s16 = sadd.s32 1, %s946_s11 }
   0x8   : > { %s23_s17 = ssub.s32 %s950_s12, %s1004_s15  ;;  %p33_p0 = scmp.ne.s32.totalorder %s946_s11, %s942_s10 }
   0x9   : > { %p24_p1 = scmp.eq.s32.totalorder %s23_s17, 0  ;;  %p34_p2 = scmp.eq.s32.totalorder %s950_s12, 0 }
   0xa   : > { %p39_p3 = scmp.ne.s32.totalorder %s942_s10, %s938_s9  ;;  %p1385_p4 = scmp.eq.s32.totalorder %s1000_s13, 0 }
   0xb   : > { %s1016_s18 = scalar_select %p24_p1, %s946_s11, %s26_s16  }
   0xc   : > { %p1018_p5 = por %p34_p2, %p33_p0  ;;  %p1024_p6 = por %p1385_p4, %p39_p3 }
   0xd   : > { %p84_p7 = scmp.eq.s32.totalorder %s1000_s13, 1  ;;  %p90_p8 = scmp.eq.s32.totalorder %s639_s14, 1 }
   0xe   : > { %s1389_s19 = scalar_select %p1018_p5, 1, 0 }
   0xf   : > { %s1390_s20 = scalar_select %p1024_p6, 1, 0 }
  0x10   : > { %p640_p9 = scmp.ge.s32.totalorder %s950_s12, 1  ;;  %p97_p10 = scmp.lt.s32.totalorder %s950_s12, 3 }
  0x11   : > { %p1031_p11 = por %p84_p7, %p33_p0  ;;  %p1035_p12 = por %p90_p8, %p39_p3 }
  0x12   : > { %p1039_p13 = pnand %p640_p9, %p97_p10  ;;  %s952_s24 = smov [#allocation6]  }
  0x13   : > { %s1391_s21 = scalar_select %p1031_p11, 1, 0 }
  0x14   : > { %s1392_s22 = scalar_select %p1035_p12, 1, 0 }
  0x15   : > { %s1393_s23 = scalar_select %p1039_p13, 1, 0 }
  0x16   : > { %p758_p1 = pneg %p1039_p13  ;;  %s109_s25 = sshll.u32 %s952_s24, 4  ;;  %s110_s25 = int_to_ptr.vmem [resolvable:$true] %s109_s25 }
  0x17   : > { %s123_s27 = sand.u32 1, %s946_s11   ;;  %s822_s30 = scalar_lea.hbm %s1383_s1, 512 }
  0x18   : > { %p1047_p2 = pnand %p758_p1, %p1385_p4  ;;  %p823_p7 = scmp.ne.s32.totalorder %s1383_s1, %s822_s30 }
  0x19   : > { %p829_p1 = scmp.lt.u32.totalorder %s822_s30, %s1383_s1 }
  0x1a   : > { %p824_p8 = pneg %p1047_p2 }
  0x1c   : > { %p825_p9 = pnand %p824_p8, %p823_p7 }
  0x1e   : > { %p826_p10 = pneg %p825_p9 }
  0x20   : > { %p831_p4 = pnand %p829_p1, %p826_p10 }
  0x22   : > { %834 = shalt.err (!%p831_p4)
}
  0x23   : > { %s835_s7 = scalar_lea.vmem %s110_s25, 512  ;;  %p843_p11 = scmp.lt.s32.totalorder %s110_s25, %s110_s25 }
  0x24   : > { %p836_p0 = scmp.ne.s32.totalorder %s110_s25, %s835_s7  ;;  %p844_p6 = scmp.lt.s32.totalorder %s835_s7, %s835_s7 }
  0x26   : > { %p838_p3 = pnand %p836_p0, %p824_p8  ;;  %p845_p13 = por %p844_p6, %p843_p11 }
  0x28   : > { %p839_p12 = pneg %p838_p3 }
  0x2a   : > { %p846_p5 = pnand %p845_p13, %p839_p12 }
  0x2c   : > { %849 = shalt.err (!%p846_p5)
}
  0x2d   : > { %s953_s8 = smov 128   ;;  %s954_s14 = smov 8  }
  0x2e   : > { %761 = dma.hbm_to_vmem [thread:$0]  (!%p1047_p2), %s1383_s1, 512, %s110_s25, [#allocation7], %s953_s8, %s953_s8, %s954_s14  }
  0x2f   : > { %p1395_p4 = scmp.ne.s32.totalorder %s1389_s19, 0  ;;  %p1396_p0 = scmp.lt.s32.totalorder %s950_s12, 2 }
  0x30   : > { %s643_s28 = sshll.u32 %s123_s27, 4  ;;  %s644_s29 = sshll.u32 %s950_s12, 7 }
  0x31   : > { %p1077_p3 = pnand %p1396_p0, %p1395_p4  ;;  %s1085_s26 = scalar_lea.hbm %s1382_s0, %s644_s29 }
  0x32   : > { %s127_s25 = scalar_lea.vmem [#allocation3], %s643_s28  ;;  %s1089_s4 = scalar_lea.sflag [#allocation4], %s123_s27 }
  0x33   : > { %s133_s19 = sshll.u32 %s127_s25, 4  ;;  %s850_s5 = scalar_lea.hbm %s1085_s26, 256  ;;  %s1087_s19 = int_to_ptr.vmem [resolvable:$true] %s133_s19 }
  0x34   : > { %p851_p5 = scmp.ne.s32.totalorder %s1085_s26, %s850_s5  ;;  %p852_p6 = pneg %p1077_p3 }
  0x35   : > { %s855_s16 = scalar_lea.hbm %s1382_s0, 512  ;;  %p856_p13 = scmp.lt.u32.totalorder %s1085_s26, %s1382_s0 }
  0x36   : > { %p853_p11 = pnand %p852_p6, %p851_p5  ;;  %p857_p2 = scmp.lt.u32.totalorder %s855_s16, %s850_s5 }
  0x37   : > { %p859_p8 = scmp.lt.u32.totalorder %s850_s5, %s1085_s26 }
  0x38   : > { %p854_p12 = pneg %p853_p11  ;;  %p858_p7 = por %p857_p2, %p856_p13 }
  0x3a   : > { %p860_p9 = por %p859_p8, %p858_p7 }
  0x3c   : > { %p861_p10 = pnand %p860_p9, %p854_p12 }
  0x3e   : > { %864 = shalt.err (!%p861_p10)
}
  0x3f   : > { %s865_s27 = scalar_lea.vmem %s1087_s19, 256  ;;  %s955_s28 = smov [#allocation3]  }
  0x40   : > { %p866_p1 = scmp.ne.s32.totalorder %s1087_s19, %s865_s27  ;;  %s870_s30 = sshll.u32 %s955_s28, 4  ;;  %s871_s30 = int_to_ptr.vmem [resolvable:$false] %s870_s30 }
  0x41   : > { %s872_s3 = scalar_lea.vmem %s871_s30, 512  ;;  %p873_p5 = scmp.lt.s32.totalorder %s1087_s19, %s871_s30 }
  0x42   : > { %p868_p4 = pnand %p866_p1, %p852_p6  ;;  %p874_p11 = scmp.lt.s32.totalorder %s872_s3, %s865_s27 }
  0x44   : > { %p869_p0 = pneg %p868_p4  ;;  %p875_p13 = por %p874_p11, %p873_p5 }
  0x46   : > { %p876_p2 = pnand %p875_p13, %p869_p0 }
  0x48   : > { %879 = shalt.err (!%p876_p2)
}
  0x49   : > { %s956_s25 = smov 256   ;;  %p1398_p6 = scmp.ne.s32.totalorder %s1393_s23, 0 }
  0x4a   : > { %765 = dma.hbm_to_vmem [thread:$0]  (!%p1077_p3), %s1085_s26, 256, %s1087_s19, %s1089_s4, %s956_s25, %s953_s8, %s954_s14  }
  0x4b   : > { %145 = sbr.rel (%p1398_p6) target bundleno = 367 (0x16f), region = 28  ;;  %s1122_s5 = sand.u32 (!%p1398_p6), 1, %s942_s10  }
  0x4c   : > { %s646_s6 = sshll.u32 (!%p1398_p6), %s1122_s5, 4  ;;  %s148_s7 = scalar_lea.sflag (!%p1398_p6), [#allocation4], %s1122_s5 }
  0x4d   : > { %s1126_s16 = scalar_lea.vmem (!%p1398_p6), [#allocation3], %s646_s6  ;;  %p1399_p12 = scmp.ne.s32.totalorder (!%p1398_p6), %s1390_s20, 0 }
  0x52   : > { %925 = dma.done.wait (%p1399_p12), %s148_s7, 256  }
  0x53   : > { %927 = vsyncadd (%p1399_p12), %s148_s7, 4294967040  ;;  %p1400_p3 = scmp.eq.s32.totalorder %s1000_s13, 0 }
  0x55   : > { %929 = dma.done.wait (%p1400_p3), [#allocation7], 512   ;;  %p1401_p7 = pmov %p1400_p3 }
  0x56   : > { %v177_v0 = vlaneseq  ;;  %v957_v1 = vmov 0   ;;  %v649_v5 = vld [vmem:[%s1126_s16] ss:$0 sm:$0xff]  ;;  %v958_v14 = vmov 1.0|1.0   ;;  %v959_v40 = vmov 0.0  }
  0x57   : > { %931 = vsyncadd (%p1401_p7), [#allocation7], 4294966784  ;;  %490 = vmatprep.subr.bf16.mxu0 %v957_v1  ;;  %728 = vmatprep.subr.bf16.mxu1 %v957_v1  ;;  %v193_v6 = vld [vmem:[%s1126_s16] sm:$0x1]  ;;  %v289_v18 = vld [vmem:[%s1126_s16 + $0x1] sm:$0x1] }
  0x58   : > { %v1138_v2 = vshrl.u32 %v177_v0, 7  ;;  %v207_v7 = vld [vmem:[%s1126_s16] sm:$0x1]  ;;  %v652_v8 = vadd.s32 4294967280, %v193_v6  ;;  %v673_v24 = vadd.s32 4294967184, %v289_v18  ;;  %s648_s20 = sshll.u32 %s1122_s5, 5 }
  0x59   : > { %v655_v9 = vadd.s32 4294967264, %v207_v7  ;;  %v221_v10 = vld [vmem:[%s1126_s16] sm:$0x1]  ;;  %v303_v25 = vld [vmem:[%s1126_s16 + $0x2] sm:$0x1]  ;;  %s175_s23 = scalar_lea.vmem [#allocation8], %s648_s20 }
  0x5a   : > { %v1141_v3 = vadd.s32 8, %v1138_v2  ;;  %v1144_v4 = vsub.s32 0, %v1138_v2  ;;  %vm185_vm0 = vcmp.eq.s32.totalorder %v1138_v2, %v649_v5  ;;  %v235_v11 = vld [vmem:[%s1126_s16] sm:$0x1]  ;;  %v658_v12 = vadd.s32 4294967248, %v221_v10  ;;  %s556_s8 = sshll.u32 %s175_s23, 4  ;;  %s1333_s8 = int_to_ptr.vmem [resolvable:$true] %s556_s8 }
  0x5b   : > { %v661_v13 = vadd.s32 4294967232, %v235_v11  ;;  %v277_v17 = vld [vmem:[%s1126_s16] sm:$0x1]  ;;  %v319_v26 = vld [vmem:[%s1126_s16 + $0x2] sm:$0x1]  ;;  %v676_v34 = vadd.s32 4294967184, %v303_v25 }
  0x5c   : > { %vm186_vm1 = vcmp.eq.s32.totalorder %v1141_v3, %v649_v5  ;;  %v198_v15 = vrot.slane %v652_v8, %v1144_v4  ;;  %v212_v16 = vrot.slane %v655_v9, %v1144_v4  ;;  %v226_v19 = vrot.slane %v658_v12, %v1144_v4  ;;  %v249_v21 = vld [vmem:[%s1126_s16] sm:$0x1]  ;;  %v331_v27 = vld [vmem:[%s1126_s16 + $0x3] sm:$0x1]  ;;  %v359_v38 = vld [vmem:[%s1126_s16 + $0x4] sm:$0x1] }
  0x5d   : > { %vm714_vm2 = vmpackc.low %vm186_vm1, %vm185_vm0  ;;  %v1163_v20 = vrot.slane %v661_v13, %v1144_v4  ;;  %v263_v22 = vld [vmem:[%s1126_s16] sm:$0x1]  ;;  %v670_v23 = vadd.s32 4294967184, %v277_v17  ;;  %v347_v28 = vld [vmem:[%s1126_s16 + $0x3] sm:$0x1]  ;;  %v664_v29 = vadd.s32 4294967216, %v249_v21  ;;  %v294_v33 = vrot.slane %v673_v24, %v1144_v4 }
  0x5e   : > { %715 = vmatpush1.bf16.msk.msra.mxu0 %vm714_vm2, %v958_v14  ;;  %739 = vmatpush1.bf16.msk.msra.mxu1 %vm714_vm2, %v958_v14  ;;  %vm199_vm3 = vcmp.eq.s32.totalorder %v1138_v2, %v198_v15  ;;  %vm200_vm4 = vcmp.eq.s32.totalorder %v1141_v3, %v198_v15  ;;  %vm213_vm5 = vcmp.eq.s32.totalorder %v1138_v2, %v212_v16  ;;  %v667_v30 = vadd.s32 4294967200, %v263_v22  ;;  %v818_v39 = vld [vmem:[#allocation6 + $0x4] ss:$8 sps:$4 sm:$0xff]   ;;  %v821_v50 = vld [vmem:[#allocation6 + $0x14] ss:$8 sps:$4 sm:$0xff]   ;;  %s711_s14 = sshll.u32 %s1000_s13, 7 }
  0x5f   : > { %492 = vmatprep.subr.bf16.mxu0 %v957_v1  ;;  %729 = vmatprep.subr.bf16.mxu1 %v957_v1  ;;  %vm214_vm6 = vcmp.eq.s32.totalorder %v1141_v3, %v212_v16  ;;  %vm716_vm7 = vmpackc.low %vm200_vm4, %vm199_vm3  ;;  %vm227_vm8 = vcmp.eq.s32.totalorder %v1138_v2, %v226_v19  ;;  %v282_v31 = vrot.slane %v670_v23, %v1144_v4  ;;  %v679_v35 = vadd.s32 4294967168, %v319_v26  ;;  %v373_v55 = vld [vmem:[%s1126_s16 + $0x5] sm:$0x1]  ;;  %v401_v7 = vld [vmem:[%s1126_s16 + $0x6] sm:$0x1]  ;;  %s1338_s19 = scalar_lea.hbm %s1384_s2, %s711_s14  ;;  %s544_s13 = scalar_lea.sflag [#allocation5], %s1122_s5 }
  0x60   : > { %vm1183_vm9 = vmpackc.low %vm214_vm6, %vm213_vm5  ;;  %vm228_vm10 = vcmp.eq.s32.totalorder %v1141_v3, %v226_v19  ;;  %vm241_vm11 = vcmp.eq.s32.totalorder %v1138_v2, %v1163_v20  ;;  %vm242_vm12 = vcmp.eq.s32.totalorder %v1141_v3, %v1163_v20  ;;  %v682_v36 = vadd.s32 4294967168, %v331_v27  ;;  %v389_v56 = vld [vmem:[%s1126_s16 + $0x5] sm:$0x1]  ;;  %522 = vmatprep.mubr.bf16.mxu0 %v818_v39  ;;  %530 = vmatprep.mubr.bf16.mxu1 %v821_v50  ;;  %v415_v19 = vld [vmem:[%s1126_s16 + $0x7] sm:$0x1]  ;;  %s880_s4 = scalar_lea.vmem %s1333_s8, 512 }
  0x61   : > { %v685_v37 = vadd.s32 4294967152, %v347_v28  ;;  %vm283_vm13 = vcmp.eq.s32.totalorder %v1138_v2, %v282_v31  ;;  %vm284_vm14 = vcmp.eq.s32.totalorder %v1141_v3, %v282_v31  ;;  %vm295_vm15 = vcmp.eq.s32.totalorder %v1138_v2, %v294_v33  ;;  %vm1214_vm1 = vmpackc.low %vm228_vm10, %vm227_vm8  ;;  %v429_v20 = vld [vmem:[%s1126_s16 + $0x8] sm:$0x1]  ;;  %p881_p8 = scmp.ne.s32.totalorder %s1333_s8, %s880_s4  ;;  %p1406_p9 = scmp.ne.s32.totalorder %s1391_s21, 0 }
  0x62   : > { %717 = vmatpush1.bf16.msk.msra.mxu0 %vm716_vm7, %v958_v14  ;;  %740 = vmatpush1.bf16.msk.msra.mxu1 %vm716_vm7, %v958_v14  ;;  %vm296_vm0 = vcmp.eq.s32.totalorder %v1141_v3, %v294_v33  ;;  %v671_v41 = vsel %vm283_vm13, 1.0, %v959_v40  ;;  %v672_v42 = vsel %vm284_vm14, 1.0, %v959_v40  ;;  %v674_v43 = vsel %vm295_vm15, 1.0, %v959_v40  ;;  %vm722_vm6 = vmpackc.low %vm242_vm12, %vm241_vm11  ;;  %s960_s17 = smov [#allocation8]  }
  0x63   : > { %494 = vmatprep.subr.bf16.mxu0 %v957_v1  ;;  %730 = vmatprep.subr.bf16.mxu1 %v957_v1  ;;  %v675_v44 = vsel %vm296_vm0, 1.0, %v959_v40  ;;  %v254_v46 = vrot.slane %v664_v29, %v1144_v4  ;;  %v1220_v47 = vrot.slane %v667_v30, %v1144_v4  ;;  %v308_v48 = vrot.slane %v676_v34, %v1144_v4  ;;  %p882_p10 = pnand %p881_p8, %p1406_p9  ;;  %s884_s29 = sshll.u32 %s960_s17, 4  ;;  %s885_s29 = int_to_ptr.vmem [resolvable:$false] %s884_s29 }
  0x64   : > { %v688_v49 = vadd.s32 4294967152, %v359_v38  ;;  %v301_v51 = vadd.f32 %v674_v43, %v671_v41  ;;  %v302_v52 = vadd.f32 %v675_v44, %v672_v42  ;;  %v324_v53 = vrot.slane %v679_v35, %v1144_v4  ;;  %s886_s27 = scalar_lea.vmem %s885_s29, 1024  ;;  %p887_p4 = scmp.lt.s32.totalorder %s1333_s8, %s885_s29 }
  0x65   : > { %v336_v54 = vrot.slane %v682_v36, %v1144_v4  ;;  %vm309_vm2 = vcmp.eq.s32.totalorder %v1138_v2, %v308_v48  ;;  %vm310_vm3 = vcmp.eq.s32.totalorder %v1141_v3, %v308_v48  ;;  %v352_v57 = vrot.slane %v685_v37, %v1144_v4  ;;  %v816_v48 = vld [vmem:[#allocation6] ss:$8 sps:$4 sm:$0xff]   ;;  %p883_p1 = pneg %p882_p10  ;;  %p888_p0 = scmp.lt.s32.totalorder %s886_s27, %s880_s4 }
  0x66   : > { %719 = vmatpush1.bf16.msk.msra.mxu0 %vm1183_vm9, %v958_v14  ;;  %741 = vmatpush1.bf16.msk.msra.mxu1 %vm1183_vm9, %v958_v14  ;;  %v364_v58 = vrot.slane %v688_v49, %v1144_v4  ;;  %v677_v59 = vsel %vm309_vm2, 1.0, %v959_v40  ;;  %v678_v60 = vsel %vm310_vm3, 1.0, %v959_v40  ;;  %vm325_vm4 = vcmp.eq.s32.totalorder %v1138_v2, %v324_v53 }
  0x67   : > { %496 = vmatprep.subr.bf16.mxu0 %v957_v1  ;;  %731 = vmatprep.subr.bf16.mxu1 %v957_v1  ;;  %vm326_vm5 = vcmp.eq.s32.totalorder %v1141_v3, %v324_v53  ;;  %vm255_vm7 = vcmp.eq.s32.totalorder %v1138_v2, %v254_v46  ;;  %vm256_vm8 = vcmp.eq.s32.totalorder %v1141_v3, %v254_v46  ;;  %v691_v61 = vadd.s32 4294967152, %v373_v55  ;;  %p889_p5 = por %p888_p0, %p887_p4 }
  0x68   : > { %v694_v62 = vadd.s32 4294967136, %v389_v56  ;;  %vm269_vm9 = vcmp.eq.s32.totalorder %v1138_v2, %v1220_v47  ;;  %v315_v63 = vadd.f32 %v677_v59, %v301_v51  ;;  %vm337_vm10 = vcmp.eq.s32.totalorder %v1138_v2, %v336_v54  ;;  %vm724_vm15 = vmpackc.low %vm256_vm8, %vm255_vm7 }
  0x69   : > { %vm338_vm13 = vcmp.eq.s32.totalorder %v1141_v3, %v336_v54  ;;  %v316_v0 = vadd.f32 %v678_v60, %v302_v52  ;;  %v680_v5 = vsel %vm325_vm4, 1.0, %v959_v40  ;;  %v681_v6 = vsel %vm326_vm5, 1.0, %v959_v40  ;;  %p890_p11 = pnand %p889_p5, %p883_p1 }
  0x6a   : > { %721 = vmatpush1.bf16.msk.msra.mxu0 %vm1214_vm1, %v958_v14  ;;  %742 = vmatpush1.bf16.msk.msra.mxu1 %vm1214_vm1, %v958_v14  ;;  %vm353_vm11 = vcmp.eq.s32.totalorder %v1138_v2, %v352_v57  ;;  %v683_v8 = vsel %vm337_vm10, 1.0, %v959_v40  ;;  %v684_v9 = vsel %vm338_vm13, 1.0, %v959_v40  ;;  %vm354_vm12 = vcmp.eq.s32.totalorder %v1141_v3, %v352_v57 }
  0x6b   : > { %498 = vmatprep.subr.bf16.mxu0 %v957_v1  ;;  %732 = vmatprep.subr.bf16.mxu1 %v957_v1  ;;  %vm365_vm14 = vcmp.eq.s32.totalorder %v1138_v2, %v364_v58  ;;  %vm366_vm0 = vcmp.eq.s32.totalorder %v1141_v3, %v364_v58  ;;  %v378_v10 = vrot.slane %v691_v61, %v1144_v4  ;;  %v686_v12 = vsel %vm353_vm11, 1.0, %v959_v40 }
  0x6c   : > { %v394_v11 = vrot.slane %v694_v62, %v1144_v4  ;;  %vm270_vm1 = vcmp.eq.s32.totalorder %v1141_v3, %v1220_v47  ;;  %v689_v13 = vsel %vm365_vm14, 1.0, %v959_v40  ;;  %v697_v15 = vadd.s32 4294967136, %v401_v7 }
  0x6d   : > { %v317_v16 = vpack.c.bf16 %v316_v0, %v315_v63  ;;  %v343_v17 = vadd.f32 %v683_v8, %v680_v5  ;;  %v344_v18 = vadd.f32 %v684_v9, %v681_v6  ;;  %v687_v21 = vsel %vm354_vm12, 1.0, %v959_v40  ;;  %vm726_vm5 = vmpackc.low %vm270_vm1, %vm269_vm9 }
  0x6e   : > { %723 = vmatpush1.bf16.msk.msra.mxu0 %vm722_vm6, %v958_v14  ;;  %743 = vmatpush1.bf16.msk.msra.mxu1 %vm722_vm6, %v958_v14  ;;  %vm395_vm2 = vcmp.eq.s32.totalorder %v1138_v2, %v394_v11  ;;  %v690_v22 = vsel %vm366_vm0, 1.0, %v959_v40  ;;  %vm379_vm3 = vcmp.eq.s32.totalorder %v1138_v2, %v378_v10  ;;  %vm396_vm4 = vcmp.eq.s32.totalorder %v1141_v3, %v394_v11 }
  0x6f   : > { %500 = vmatprep.subr.bf16.mxu0 %v957_v1  ;;  %733 = vmatprep.subr.bf16.mxu1 %v957_v1  ;;  %v371_v23 = vadd.f32 %v689_v13, %v686_v12  ;;  %vm380_vm6 = vcmp.eq.s32.totalorder %v1141_v3, %v378_v10  ;;  %v406_v24 = vrot.slane %v697_v15, %v1144_v4  ;;  %v695_v25 = vsel %vm395_vm2, 1.0, %v959_v40 }
  0x70   : > { %v696_v26 = vsel %vm396_vm4, 1.0, %v959_v40  ;;  %v700_v27 = vadd.s32 4294967136, %v415_v19  ;;  %v703_v28 = vadd.s32 4294967136, %v429_v20  ;;  %v372_v29 = vadd.f32 %v690_v22, %v687_v21 }
  0x71   : > { %v692_v30 = vsel %vm379_vm3, 1.0, %v959_v40  ;;  %vm407_vm7 = vcmp.eq.s32.totalorder %v1138_v2, %v406_v24  ;;  %vm408_vm8 = vcmp.eq.s32.totalorder %v1141_v3, %v406_v24  ;;  %v693_v35 = vsel %vm380_vm6, 1.0, %v959_v40 }
  0x72   : > { %725 = vmatpush1.bf16.msk.msra.mxu0 %vm724_vm15, %v958_v14  ;;  %744 = vmatpush1.bf16.msk.msra.mxu1 %vm724_vm15, %v958_v14  ;;  %v698_v31 = vsel %vm407_vm7, 1.0, %v959_v40  ;;  %v699_v32 = vsel %vm408_vm8, 1.0, %v959_v40  ;;  %v420_v33 = vrot.slane %v700_v27, %v1144_v4  ;;  %v434_v34 = vrot.slane %v703_v28, %v1144_v4 }
  0x73   : > { %502 = vmatprep.subr.bf16.mxu0 %v957_v1  ;;  %734 = vmatprep.subr.bf16.mxu1 %v957_v1  ;;  %v413_v36 = vadd.f32 %v698_v31, %v695_v25  ;;  %v414_v37 = vadd.f32 %v699_v32, %v696_v26  ;;  %v385_v4 = vadd.f32 %v692_v30, %v371_v23 }
  0x74   : > { %vm421_vm9 = vcmp.eq.s32.totalorder %v1138_v2, %v420_v33  ;;  %vm422_vm10 = vcmp.eq.s32.totalorder %v1141_v3, %v420_v33  ;;  %vm435_vm13 = vcmp.eq.s32.totalorder %v1138_v2, %v434_v34  ;;  %vm436_vm11 = vcmp.eq.s32.totalorder %v1141_v3, %v434_v34 }
  0x75   : > { %v701_v38 = vsel %vm421_vm9, 1.0, %v959_v40  ;;  %v702_v39 = vsel %vm422_vm10, 1.0, %v959_v40  ;;  %v386_v41 = vadd.f32 %v693_v35, %v372_v29  ;;  %v704_v44 = vsel %vm435_vm13, 1.0, %v959_v40 }
  0x76   : > { %727 = vmatpush1.bf16.msk.msra.mxu0 %vm726_vm5, %v958_v14  ;;  %745 = vmatpush1.bf16.msk.msra.mxu1 %vm726_vm5, %v958_v14  ;;  %v345_v14 = vpack.c.bf16 %v344_v18, %v343_v17  ;;  %v427_v42 = vadd.f32 %v701_v38, %v413_v36  ;;  %v428_v43 = vadd.f32 %v702_v39, %v414_v37  ;;  %v705_v2 = vsel %vm436_vm11, 1.0, %v959_v40  ;;  %v819_v40 = vld [vmem:[#allocation6 + $0x10] ss:$8 sps:$4 sm:$0xff]  }
  0x77   : > { %504 = vmatprep.subr.bf16.mxu0 %v957_v1  ;;  %735 = vmatprep.subr.bf16.mxu1 %v957_v1  ;;  %v387_v3 = vpack.c.bf16 %v386_v41, %v385_v4 }
  0x78   : > { %v441_v45 = vadd.f32 %v704_v44, %v427_v42  ;;  %v442_v46 = vadd.f32 %v705_v2, %v428_v43 }
  0x7a   : > { %505 = vmatpush1.bf16.msra.mxu0 %v317_v16  ;;  %746 = vmatpush1.bf16.msra.mxu1 %v317_v16  ;;  %v443_v47 = vpack.c.bf16 %v442_v46, %v441_v45 }
  0x7b   : > { %506 = vmatprep.subr.bf16.mxu0 %v957_v1  ;;  %736 = vmatprep.subr.bf16.mxu1 %v957_v1 }
  0x7e   : > { %507 = vmatpush1.bf16.msra.mxu0 %v345_v14  ;;  %747 = vmatpush1.bf16.msra.mxu1 %v345_v14 }
  0x7f   : > { %508 = vmatprep.subr.bf16.mxu0 %v957_v1  ;;  %737 = vmatprep.subr.bf16.mxu1 %v957_v1 }
  0x82   : > { %509 = vmatpush1.bf16.msra.mxu0 %v387_v3  ;;  %748 = vmatpush1.bf16.msra.mxu1 %v387_v3 }
  0x83   : > { %510 = vmatprep.subr.bf16.mxu0 %v957_v1  ;;  %738 = vmatprep.subr.bf16.mxu1 %v957_v1 }
  0x86   : > { %511 = vmatpush1.bf16.msra.mxu0 %v443_v47  ;;  %749 = vmatpush1.bf16.msra.mxu1 %v443_v47 }
  0x89   : > { %523 = vmatmul.mubr.bf16.vlgmr.msra.gmra.mrb[0].mxu0 %v816_v48  ;;  %531 = vmatmul.mubr.bf16.vlgmr.msra.gmra.mrb[0].mxu1 %v819_v40 }
 0x15c   : > { %v524_v49 = vpop.f32.mrb[0].mxu0  ;;  %v532_v50 = vpop.f32.mrb[0].mxu1 }
 0x15d   : > { %539 = vst [vmem:[%s175_s23] sm:$0xff] %v524_v49  ;;  %541 = vst [vmem:[%s175_s23 + $0x10] sm:$0xff] %v532_v50  ;;  %v526_v1 = vpop.f32.mrb[1].mxu0  ;;  %v534_v51 = vpop.f32.mrb[1].mxu1 }
 0x15e   : > { %v527_v52 = vpop.f32.mrb[2].mxu0  ;;  %v535_v53 = vpop.f32.mrb[2].mxu1 }
 0x15f   : > { %540 = vst [vmem:[%s175_s23 + $0x8] sm:$0xff] %v527_v52  ;;  %542 = vst [vmem:[%s175_s23 + $0x18] sm:$0xff] %v535_v53  ;;  %v529_v54 = vpop.f32.mrb[3].mxu0  ;;  %v537_v55 = vpop.f32.mrb[3].mxu1 }
 0x160   : > { %893 = shalt.err (!%p890_p11)
}
 0x161   : > { %s894_s28 = scalar_lea.hbm %s1338_s19, 512  ;;  %s898_s25 = scalar_lea.hbm %s1384_s2, 1024 }
 0x162   : > { %p895_p13 = scmp.ne.s32.totalorder %s1338_s19, %s894_s28  ;;  %p899_p12 = scmp.lt.u32.totalorder %s1338_s19, %s1384_s2 }
 0x163   : > { %p900_p3 = scmp.lt.u32.totalorder %s898_s25, %s894_s28  ;;  %p902_p8 = scmp.lt.u32.totalorder %s894_s28, %s1338_s19 }
 0x164   : > { %p896_p2 = pnand %p895_p13, %p1406_p9 }
 0x165   : > { %p901_p7 = por %p900_p3, %p899_p12 }
 0x166   : > { %p897_p6 = pneg %p896_p2 }
 0x167   : > { %p903_p10 = por %p902_p8, %p901_p7 }
 0x169   : > { %p904_p1 = pnand %p903_p10, %p897_p6 }
 0x16b   : > { %907 = shalt.err (!%p904_p1)
}
 0x16c   : > { %s961_s16 = smov 128   ;;  %s962_s20 = smov 256  }
 0x16d   : > { %s963_s23 = smov 8  }
 0x16e   : > { %756 = dma.vmem_to_hbm [thread:$0]  (%p1406_p9), %s1333_s8, 512, %s1338_s19, %s544_s13, %s961_s16, %s962_s20, %s963_s23  }
 0x16f PF: > { %s571_s14 = sand.u32 1, %s938_s9   ;;  %p1407_p4 = scmp.ne.s32.totalorder %s1392_s22, 0 }
 0x170   : > { %p1408_p0 = scmp.ge.s32.totalorder %s950_s12, 2  ;;  %s572_s24 = scalar_lea.sflag [#allocation5], %s571_s14 }
 0x172   : > { %p767_p5 = pnand %p1408_p0, %p1407_p4 }
 0x174   : > { %933 = dma.done.wait (!%p767_p5), %s572_s24, 512  }
 0x175   : > { %935 = vsyncadd (!%p767_p5), %s572_s24, 4294966784  ;;  %p16_p11 = scmp.ge.s32.totalorder %s1004_s15, 4   ;;  %s1409_s9 = smov %s942_s10 }
 0x176   : > { %s1410_s10 = smov %s946_s11  ;;  %s1411_s11 = smov %s1016_s18 }
 0x177   : > { %s1412_s12 = smov %s1004_s15  ;;  %18 = sbr.rel (!%p16_p11) target bundleno = 6 (0x6), region = 77 }
 0x17e   :  { %577 = vsyncpa [#allocation4], 1 }
 0x17f   :  { %579 = vsyncpa [#allocation4 + $0x1], 1 }
 0x180   :  { %580 = vsyncpa [#allocation7], 1 }
 0x181   :  { %581 = vsyncpa [#allocation5], 1 }
 0x182   :  { %583 = vsyncpa [#allocation5 + $0x1], 1 }

</bundles_post_ra>
